<compile_context>
chip_gen: v5e
topology: v5e:2x2
jax: 0.10.0
libtpu: 0.0.40
codegen_flags: <defaults>
</compile_context>

<pallas_src>
import jax
import jax.numpy as jnp
from jax.experimental import pallas as pl
from jax.experimental.pallas import tpu as pltpu

D_IN = 300
D_HID = 300
D_OUT = 2
D_OUT_PAD = 128          # lane-dense padded output width


def net4sa_kernel(x_ref, w1_ref, b1_ref, w2_ref, b2_ref, out_ref):
    # x_ref: (TB, S, D_IN). Sum over the sequence axis in the input dtype
    # (PyTorch's `out += sentence[:, i, :]` loop); cast only the reduced tile.
    s = jnp.sum(x_ref[...], axis=1).astype(jnp.float32)              # (TB, D_IN)

    # MLP1: (TB, D_IN) @ (D_IN, D_HID) + b1  (MXU, f32 accumulate)
    h = jnp.dot(s, w1_ref[...], preferred_element_type=jnp.float32) + b1_ref[...]

    # Penalized tanh: 0.75*relu(tanh(h)) + 0.25*tanh(h) == where(t>0, t, 0.25*t)
    t = jnp.tanh(h)                                                   # EUP
    p = jnp.where(t > 0, t, 0.25 * t)                                 # 1 VPU select

    # MLP2 on lane-dense padded weights: (TB, D_HID) @ (D_HID, 128) + b2_pad.
    # Padded bias columns are -1e30 -> exp underflows to 0 -> softmax over the
    # 128 lanes equals the exact 2-class softmax.
    logits = jnp.dot(p, w2_ref[...], preferred_element_type=jnp.float32) + b2_ref[...]

    m = jnp.max(logits, axis=-1, keepdims=True)
    e = jnp.exp(logits - m)
    denom = jnp.sum(e, axis=-1, keepdims=True)
    out_ref[...] = e * pl.reciprocal(denom, approx=True)              # (TB, 128)


def _choose_batch_tile(B):
    # >=512 rows approaches the HBM roofline and keeps the MXU rows full
    # (512 is a multiple of both 128 and 256); small batches round up to the
    # 8-row sublane granule.
    if B >= 512:
        return 512
    return max(8, ((B + 7) // 8) * 8)


def net4sa_forward(sentence, w1, b1, w2, b2):
    B, S, D = sentence.shape
    assert D == D_IN

    TB = _choose_batch_tile(B)
    n_blocks = pl.cdiv(B, TB)
    B_pad = n_blocks * TB
    if B_pad != B:
        sentence = jnp.pad(sentence, ((0, B_pad - B), (0, 0), (0, 0)))

    # Lane-dense second layer: zero-pad W2 columns, push padded bias to -1e30.
    w2p = jnp.zeros((D_HID, D_OUT_PAD), jnp.float32).at[:, :D_OUT].set(w2)
    b2p = jnp.full((1, D_OUT_PAD), -1e30, jnp.float32).at[:, :D_OUT].set(b2)

    # Explicit VMEM budget: double-buffered input + output tiles, resident
    # weights, small margin. Capped well under v7x's 64 MiB physical VMEM.
    itemsize = jnp.dtype(sentence.dtype).itemsize
    vmem_bytes = int(
        2 * TB * S * D_IN * itemsize            # double-buffered input tile
        + 2 * TB * D_OUT_PAD * 4                # double-buffered output tile
        + (D_IN * D_HID + D_HID + D_HID * D_OUT_PAD + D_OUT_PAD) * 4
        + (4 << 20))                            # headroom
    vmem_bytes = min(vmem_bytes, 48 << 20)

    out = pl.pallas_call(
        net4sa_kernel,
        out_shape=jax.ShapeDtypeStruct((B_pad, D_OUT_PAD), jnp.float32),
        grid=(n_blocks,),
        in_specs=[
            pl.BlockSpec((TB, S, D_IN), lambda i: (i, 0, 0)),      # sentence tile
            pl.BlockSpec((D_IN, D_HID), lambda i: (0, 0)),         # W1 (resident)
            pl.BlockSpec((1, D_HID), lambda i: (0, 0)),            # b1 (resident)
            pl.BlockSpec((D_HID, D_OUT_PAD), lambda i: (0, 0)),    # W2 padded
            pl.BlockSpec((1, D_OUT_PAD), lambda i: (0, 0)),        # b2 padded
        ],
        out_specs=pl.BlockSpec((TB, D_OUT_PAD), lambda i: (i, 0)),
        compiler_params=pltpu.CompilerParams(
            dimension_semantics=("parallel",),     # megacore sharding on v7x
            vmem_limit_bytes=vmem_bytes),
    )(sentence, w1, b1, w2p, b2p)

    # Drop batch + lane padding; PyTorch returns (B, 1, 2) due to the .view.
    return out[:B, :D_OUT].reshape(B, 1, D_OUT)


def init_params(key):
    # Deterministic init mimicking torch.nn.Linear default: U(-1/sqrt(in), 1/sqrt(in)).
    k1, k2, k3, k4 = jax.random.split(key, 4)
    lim1 = 1.0 / jnp.sqrt(jnp.float32(D_IN))
    lim2 = 1.0 / jnp.sqrt(jnp.float32(D_HID))
    w1 = jax.random.uniform(k1, (D_IN, D_HID), jnp.float32, -lim1, lim1)
    b1 = jax.random.uniform(k2, (1, D_HID), jnp.float32, -lim1, lim1)
    w2 = jax.random.uniform(k3, (D_HID, D_OUT), jnp.float32, -lim2, lim2)
    b2 = jax.random.uniform(k4, (1, D_OUT), jnp.float32, -lim2, lim2)
    return w1, b1, w2, b2


if __name__ == "__main__":
    key = jax.random.PRNGKey(0)
    k_in, k_par = jax.random.split(key)

    B, S = 2, 8
    sentence = jax.random.normal(k_in, (B, S, D_IN), jnp.float32)
    w1, b1, w2, b2 = init_params(k_par)

    label = net4sa_forward(sentence, w1, b1, w2, b2)
    jax.block_until_ready(label)

    # Pure-JAX reference of the PyTorch forward pass.
    s = jnp.sum(sentence, axis=1)
    h = s @ w1 + b1
    t = jnp.tanh(h)
    p = 0.75 * jnp.maximum(t, 0.0) + 0.25 * t
    logits = p @ w2 + b2
    ref = jax.nn.softmax(logits, axis=-1).reshape(B, 1, D_OUT)
    # Tolerance accounts for the EUP approximate reciprocal in the softmax.
    assert jnp.allclose(label, ref, atol=2e-3, rtol=2e-3), "mismatch vs reference"

    print("KERNEL_OK")
</pallas_src>

<mosaic_0001>
module attributes {stable_mosaic.version = 11 : i64} {
  func.func @net4sa_kernel(%arg0: i32, %arg1: memref<8x8x300xf32, #tpu.memory_space<vmem>>, %arg2: memref<300x300xf32, #tpu.memory_space<vmem>>, %arg3: memref<1x300xf32, #tpu.memory_space<vmem>>, %arg4: memref<300x128xf32, #tpu.memory_space<vmem>>, %arg5: memref<1x128xf32, #tpu.memory_space<vmem>>, %arg6: memref<8x128xf32, #tpu.memory_space<vmem>>) attributes {dimension_semantics = [#tpu.dimension_semantics<parallel>], iteration_bounds = array<i64: 1>, scalar_prefetch = 0 : i64, scratch_operands = 0 : i64, tpu.core_type = #tpu.core_type<tc>, window_params = [{transform_indices = @transform_0, window_bounds = array<i64: 8, 8, 300>}, {pipeline_mode = #tpu.pipeline_mode<synchronous>, transform_indices = @transform_1, window_bounds = array<i64: 300, 300>}, {pipeline_mode = #tpu.pipeline_mode<synchronous>, transform_indices = @transform_2, window_bounds = array<i64: 1, 300>}, {pipeline_mode = #tpu.pipeline_mode<synchronous>, transform_indices = @transform_3, window_bounds = array<i64: 300, 128>}, {pipeline_mode = #tpu.pipeline_mode<synchronous>, transform_indices = @transform_4, window_bounds = array<i64: 1, 128>}, {transform_indices = @transform_5, window_bounds = array<i64: 8, 128>}]} {
    %c0 = arith.constant 0 : index
    %c0_0 = arith.constant 0 : index
    %c0_1 = arith.constant 0 : index
    %0 = vector.load %arg1[%c0, %c0_0, %c0_1] : memref<8x8x300xf32, #tpu.memory_space<vmem>>, vector<8x8x300xf32>
    %cst = arith.constant dense<0.000000e+00> : vector<8x300xf32>
    %1 = vector.multi_reduction <add>, %0, %cst [1] : vector<8x8x300xf32> to vector<8x300xf32>
    %c0_2 = arith.constant 0 : index
    %c0_3 = arith.constant 0 : index
    %2 = vector.load %arg2[%c0_2, %c0_3] : memref<300x300xf32, #tpu.memory_space<vmem>>, vector<300x300xf32>
    %cst_4 = arith.constant dense<0.000000e+00> : vector<8x300xf32>
    %3 = tpu.matmul %1, %2, %cst_4 {dimension_numbers = #tpu.dot_dimension_numbers<[1], [0], [0], [1], [0, 0, 1, 1], [], []>} : vector<8x300xf32>, vector<300x300xf32>, vector<8x300xf32> -> vector<8x300xf32>
    %c0_5 = arith.constant 0 : index
    %c0_6 = arith.constant 0 : index
    %4 = vector.load %arg3[%c0_5, %c0_6] : memref<1x300xf32, #tpu.memory_space<vmem>>, vector<1x300xf32>
    %5 = vector.broadcast %4 : vector<1x300xf32> to vector<8x300xf32>
    %6 = arith.addf %3, %5 : vector<8x300xf32>
    %7 = math.tanh %6 : vector<8x300xf32>
    %cst_7 = arith.constant 0.000000e+00 : f32
    %8 = vector.broadcast %cst_7 : f32 to vector<8x300xf32>
    %9 = arith.cmpf ogt, %7, %8 : vector<8x300xf32>
    %cst_8 = arith.constant 2.500000e-01 : f32
    %10 = vector.broadcast %cst_8 : f32 to vector<8x300xf32>
    %11 = arith.mulf %10, %7 : vector<8x300xf32>
    %12 = arith.select %9, %7, %11 : vector<8x300xi1>, vector<8x300xf32>
    %c0_9 = arith.constant 0 : index
    %c0_10 = arith.constant 0 : index
    %13 = vector.load %arg4[%c0_9, %c0_10] : memref<300x128xf32, #tpu.memory_space<vmem>>, vector<300x128xf32>
    %cst_11 = arith.constant dense<0.000000e+00> : vector<8x128xf32>
    %14 = tpu.matmul %12, %13, %cst_11 {dimension_numbers = #tpu.dot_dimension_numbers<[1], [0], [0], [1], [0, 0, 1, 1], [], []>} : vector<8x300xf32>, vector<300x128xf32>, vector<8x128xf32> -> vector<8x128xf32>
    %c0_12 = arith.constant 0 : index
    %c0_13 = arith.constant 0 : index
    %15 = vector.load %arg5[%c0_12, %c0_13] : memref<1x128xf32, #tpu.memory_space<vmem>>, vector<1x128xf32>
    %16 = vector.broadcast %15 : vector<1x128xf32> to vector<8x128xf32>
    %17 = arith.addf %14, %16 : vector<8x128xf32>
    %cst_14 = arith.constant dense<0xFF800000> : vector<8xf32>
    %18 = vector.multi_reduction <maximumf>, %17, %cst_14 [1] : vector<8x128xf32> to vector<8xf32>
    %19 = vector.shape_cast %18 : vector<8xf32> to vector<8x1xf32>
    %20 = vector.broadcast %19 : vector<8x1xf32> to vector<8x128xf32>
    %21 = arith.subf %17, %20 : vector<8x128xf32>
    %22 = math.exp %21 : vector<8x128xf32>
    %cst_15 = arith.constant dense<0.000000e+00> : vector<8xf32>
    %23 = vector.multi_reduction <add>, %22, %cst_15 [1] : vector<8x128xf32> to vector<8xf32>
    %24 = vector.shape_cast %23 : vector<8xf32> to vector<8x1xf32>
    %25 = tpu.reciprocal %24 {approx = true} : vector<8x1xf32> -> vector<8x1xf32>
    %26 = vector.broadcast %25 : vector<8x1xf32> to vector<8x128xf32>
    %27 = arith.mulf %22, %26 : vector<8x128xf32>
    %c0_16 = arith.constant 0 : index
    %c0_17 = arith.constant 0 : index
    %28 = vector.load %arg6[%c0_16, %c0_17] : memref<8x128xf32, #tpu.memory_space<vmem>>, vector<8x128xf32>
    tpu.vector_store %arg6[%c0_16, %c0_17], %27 {strides = array<i32>} : memref<8x128xf32, #tpu.memory_space<vmem>>, vector<8x128xf32>,
    return
  }
  func.func @transform_0(%arg0: i32) -> (i32, i32, i32) {
    %c0_i32 = arith.constant 0 : i32
    %c0_i32_0 = arith.constant 0 : i32
    %c0_i32_1 = arith.constant 0 : i32
    return %arg0, %c0_i32, %c0_i32_0 : i32, i32, i32
  }
  func.func @transform_1(%arg0: i32) -> (i32, i32) {
    %c0_i32 = arith.constant 0 : i32
    %c0_i32_0 = arith.constant 0 : i32
    %c0_i32_1 = arith.constant 0 : i32
    return %c0_i32, %c0_i32_0 : i32, i32
  }
  func.func @transform_2(%arg0: i32) -> (i32, i32) {
    %c0_i32 = arith.constant 0 : i32
    %c0_i32_0 = arith.constant 0 : i32
    %c0_i32_1 = arith.constant 0 : i32
    return %c0_i32, %c0_i32_0 : i32, i32
  }
  func.func @transform_3(%arg0: i32) -> (i32, i32) {
    %c0_i32 = arith.constant 0 : i32
    %c0_i32_0 = arith.constant 0 : i32
    %c0_i32_1 = arith.constant 0 : i32
    return %c0_i32, %c0_i32_0 : i32, i32
  }
  func.func @transform_4(%arg0: i32) -> (i32, i32) {
    %c0_i32 = arith.constant 0 : i32
    %c0_i32_0 = arith.constant 0 : i32
    %c0_i32_1 = arith.constant 0 : i32
    return %c0_i32, %c0_i32_0 : i32, i32
  }
  func.func @transform_5(%arg0: i32) -> (i32, i32) {
    %c0_i32 = arith.constant 0 : i32
    %c0_i32_0 = arith.constant 0 : i32
    return %arg0, %c0_i32 : i32, i32
  }
}

</mosaic_0001>

<bundles_post_ra>
// kernel: tpu_custom_call.1
= control target key start
LH: loop header
LB: loop body
LE: loop exit
PB: predicated region body
PF: predicated region fallthrough
CT: control target
= control target key end

     0   :  { %10 = vsyncpa [#allocation3], 0  ;;  %s1036_s0 = inlined_call_operand.hbm [shape: f32[8,8,300], index: 0, kind: input, shape index: {}]   ;;  %s1037_s1 = inlined_call_operand.hbm [shape: f32[300,300], index: 1, kind: input, shape index: {}]   ;;  %s1038_s2 = inlined_call_operand.hbm [shape: f32[1,300], index: 2, kind: input, shape index: {}]   ;;  %s1039_s3 = inlined_call_operand.hbm [shape: f32[300,128], index: 3, kind: input, shape index: {}]   ;;  %s1040_s4 = inlined_call_operand.vmem [shape: f32[1,128], index: 4, kind: input, shape index: {}]   ;;  %s1041_s5 = inlined_call_operand.hbm [shape: f32[8,128], index: 5, kind: output, shape index: {}]  }
   0x1   :  { %11 = vsyncpa [#allocation6], 0 }
   0x2   :  { %12 = vsyncpa [#allocation9], 0 }
   0x3   :  { %13 = vsyncpa [#allocation4], 0  ;;  %s31_s20 = sshll.u32 %s1037_s1, 4  ;;  %s932_s21 = smov [#allocation5]   ;;  %s32_s20 = int_to_ptr.hbm [resolvable:$true] %s31_s20 }
   0x4   :  { %s33_s22 = sshll.u32 %s932_s21, 4  ;;  %s18_s25 = sshll.u32 %s1036_s0, 4  ;;  %s34_s22 = int_to_ptr.vmem [resolvable:$true] %s33_s22  ;;  %s19_s25 = int_to_ptr.hbm [resolvable:$true] %s18_s25 }
   0x5   :  { %s933_s26 = smov 384   ;;  %s934_s27 = smov 24  }
   0x6   :  { %39 = dma.hbm_to_vmem [thread:$0]  %s32_s20, 14592, %s34_s22, [#allocation6], %s933_s26, %s933_s26, %s934_s27  }
   0x7   :  { %s935_s28 = smov [#allocation2]   ;;  %s45_s7 = sshll.u32 %s1038_s2, 4  ;;  %s46_s7 = int_to_ptr.hbm [resolvable:$true] %s45_s7 }
   0x8   :  { %s20_s29 = sshll.u32 %s935_s28, 4  ;;  %s55_s9 = sshll.u32 %s1039_s3, 4  ;;  %s21_s29 = int_to_ptr.vmem [resolvable:$true] %s20_s29  ;;  %s56_s9 = int_to_ptr.hbm [resolvable:$true] %s55_s9 }
   0x9   :  { %26 = dma.hbm_to_vmem [thread:$0]  %s19_s25, 3072, %s21_s29, [#allocation3], %s933_s26, %s933_s26, %s934_s27  }
   0xa   :  { %s936_s10 = smov [#allocation7]   ;;  %s937_s0 = smov [#allocation8]  }
   0xb   :  { %s47_s11 = sshll.u32 %s936_s10, 4  ;;  %s57_s12 = sshll.u32 %s937_s0, 4  ;;  %s48_s11 = int_to_ptr.vmem [resolvable:$true] %s47_s11  ;;  %s58_s12 = int_to_ptr.vmem [resolvable:$true] %s57_s12 }
   0xc   :  { %50 = dma.hbm_to_vmem [thread:$0]  %s46_s7, 48, %s48_s11, [#allocation6]  }
   0xd   :  { %s938_s13 = smov 128   ;;  %s939_s14 = smov 8  }
   0xe   :  { %63 = dma.hbm_to_vmem [thread:$0]  %s56_s9, 4864, %s58_s12, [#allocation9], %s938_s13, %s938_s13, %s939_s14  }
   0xf   :  { %924 = dma.done.wait [#allocation3], 3072  }
  0x10   :  { %925 = vsyncadd [#allocation3], 4294964224 }
  0x11   :  { %926 = dma.done.wait [#allocation6], 14640  }
  0x12   :  { %927 = vsyncadd [#allocation6], 4294952656 }
  0x13   :  { %928 = dma.done.wait [#allocation9], 4864  }
  0x14   :  { %929 = vsyncadd [#allocation9], 4294962432  ;;  %vm437_vm0 = vcmask 1043456   ;;  %v370_v0 = vld [vmem:[#allocation5 + $0x378] sm:$0xf]  ;;  %v305_v1 = vld [vmem:[#allocation5 + $0x170] sm:$0xff] }
  0x15   :  { %v367_v2 = vld [vmem:[#allocation5 + $0x360] sm:$0xff]  ;;  %776 = vmatpush.msk.msra.mxu2 %vm437_vm0, %v370_v0  ;;  %507 = vmatpush.msra.mxu3 %v305_v1  ;;  %v302_v3 = vld [vmem:[#allocation5 + $0x158] sm:$0xff]  ;;  %v364_v4 = vld [vmem:[#allocation5 + $0x348] sm:$0xff]  ;;  %vm118_vm1 = vcmask 359424   ;;  %vm405_vm2 = vcmask 1041409   ;;  %vm407_vm3 = vcmask 1042434  }
  0x16   :  { %v299_v5 = vld [vmem:[#allocation5 + $0x140] sm:$0xff]  ;;  %v304_v6 = vld [vmem:[#allocation5 + $0x168] sm:$0xff]  ;;  %v301_v7 = vld [vmem:[#allocation5 + $0x150] sm:$0xff]  ;;  %vm409_vm4 = vcmask 1043459   ;;  %vm411_vm5 = vcmask 1044484   ;;  %vm413_vm6 = vcmask 1045509  }
  0x17   :  { %498 = vmatpush.msra.mxu2 %v367_v2  ;;  %508 = vmatpush.msra.mxu3 %v302_v3  ;;  %v361_v8 = vld [vmem:[#allocation5 + $0x330] sm:$0xff]  ;;  %v296_v9 = vld [vmem:[#allocation5 + $0x128] sm:$0xff]  ;;  %v298_v11 = vld [vmem:[#allocation5 + $0x138] sm:$0xff]  ;;  %vm415_vm7 = vcmask 1046534   ;;  %vm417_vm8 = vcmask 1047559   ;;  %s940_s15 = smov [#allocation10]  }
  0x18   :  { %447 = vmatpush.msra.mxu0 %v304_v6  ;;  %v352_v10 = vld [vmem:[#allocation5 + $0x2e8] sm:$0xff]  ;;  %v349_v12 = vld [vmem:[#allocation5 + $0x2d0] sm:$0xff]  ;;  %v358_v13 = vld [vmem:[#allocation5 + $0x318] sm:$0xff]  ;;  %s762_s16 = sshll.u32 %s940_s15, 4  ;;  %s763_s16 = int_to_ptr.vmem [resolvable:$true] %s762_s16 }
  0x19   :  { %499 = vmatpush.msra.mxu2 %v364_v4  ;;  %509 = vmatpush.msra.mxu3 %v299_v5  ;;  %v293_v14 = vld [vmem:[#allocation5 + $0x110] sm:$0xff]  ;;  %v295_v15 = vld [vmem:[#allocation5 + $0x120] sm:$0xff]  ;;  %v346_v16 = vld [vmem:[#allocation5 + $0x2b8] sm:$0xff] }
  0x1a   :  { %448 = vmatpush.msra.mxu0 %v301_v7  ;;  %467 = vmatpush.msra.mxu1 %v352_v10  ;;  %v355_v17 = vld [vmem:[#allocation5 + $0x300] sm:$0xff]  ;;  %v290_v18 = vld [vmem:[#allocation5 + $0xf8] sm:$0xff]  ;;  %v353_v19 = vld [vmem:[#allocation5 + $0x2f0] sm:$0xff] }
  0x1b   :  { %500 = vmatpush.msra.mxu2 %v361_v8  ;;  %510 = vmatpush.msra.mxu3 %v296_v9  ;;  %v292_v20 = vld [vmem:[#allocation5 + $0x108] sm:$0xff]  ;;  %v287_v21 = vld [vmem:[#allocation5 + $0xe0] sm:$0xff]  ;;  %v350_v23 = vld [vmem:[#allocation5 + $0x2d8] sm:$0xff] }
  0x1c   :  { %449 = vmatpush.msra.mxu0 %v298_v11  ;;  %468 = vmatpush.msra.mxu1 %v349_v12  ;;  %v343_v22 = vld [vmem:[#allocation5 + $0x2a0] sm:$0xff]  ;;  %v289_v24 = vld [vmem:[#allocation5 + $0xf0] sm:$0xff]  ;;  %v284_v25 = vld [vmem:[#allocation5 + $0xc8] sm:$0xff] }
  0x1d   :  { %501 = vmatpush.msra.mxu2 %v358_v13  ;;  %511 = vmatpush.msra.mxu3 %v293_v14  ;;  %v340_v26 = vld [vmem:[#allocation5 + $0x288] sm:$0xff]  ;;  %v347_v27 = vld [vmem:[#allocation5 + $0x2c0] sm:$0xff]  ;;  %v286_v28 = vld [vmem:[#allocation5 + $0xd8] sm:$0xff] }
  0x1e   :  { %450 = vmatpush.msra.mxu0 %v295_v15  ;;  %469 = vmatpush.msra.mxu1 %v346_v16  ;;  %v281_v29 = vld [vmem:[#allocation5 + $0xb0] sm:$0xff]  ;;  %v344_v31 = vld [vmem:[#allocation5 + $0x2a8] sm:$0xff]  ;;  %v283_v32 = vld [vmem:[#allocation5 + $0xc0] sm:$0xff] }
  0x1f   :  { %502 = vmatpush.msra.mxu2 %v355_v17  ;;  %512 = vmatpush.msra.mxu3 %v290_v18  ;;  %v337_v30 = vld [vmem:[#allocation5 + $0x270] sm:$0xff]  ;;  %v278_v33 = vld [vmem:[#allocation5 + $0x98] sm:$0xff]  ;;  %v280_v36 = vld [vmem:[#allocation5 + $0xa8] sm:$0xff] }
  0x20   :  { %451 = vmatpush.msra.mxu0 %v292_v20  ;;  %470 = vmatpush.msra.mxu1 %v343_v22  ;;  %v334_v34 = vld [vmem:[#allocation5 + $0x258] sm:$0xff]  ;;  %v341_v35 = vld [vmem:[#allocation5 + $0x290] sm:$0xff]  ;;  %v275_v37 = vld [vmem:[#allocation5 + $0x80] sm:$0xff] }
  0x21   :  { %527 = vmatpush.msrb.mxu2 %v353_v19  ;;  %513 = vmatpush.msra.mxu3 %v287_v21  ;;  %v338_v38 = vld [vmem:[#allocation5 + $0x278] sm:$0xff]  ;;  %v331_v39 = vld [vmem:[#allocation5 + $0x240] sm:$0xff]  ;;  %v272_v40 = vld [vmem:[#allocation5 + $0x68] sm:$0xff] }
  0x22   :  { %452 = vmatpush.msra.mxu0 %v289_v24  ;;  %471 = vmatpush.msra.mxu1 %v340_v26  ;;  %v335_v41 = vld [vmem:[#allocation5 + $0x260] sm:$0xff]  ;;  %v277_v42 = vld [vmem:[#allocation5 + $0x90] sm:$0xff]  ;;  %v328_v44 = vld [vmem:[#allocation5 + $0x228] sm:$0xff] }
  0x23   :  { %528 = vmatpush.msrb.mxu2 %v350_v23  ;;  %514 = vmatpush.msra.mxu3 %v284_v25  ;;  %v269_v43 = vld [vmem:[#allocation5 + $0x50] sm:$0xff]  ;;  %v274_v45 = vld [vmem:[#allocation5 + $0x78] sm:$0xff]  ;;  %v332_v47 = vld [vmem:[#allocation5 + $0x248] sm:$0xff] }
  0x24   :  { %453 = vmatpush.msra.mxu0 %v286_v28  ;;  %472 = vmatpush.msra.mxu1 %v337_v30  ;;  %v325_v46 = vld [vmem:[#allocation5 + $0x210] sm:$0xff]  ;;  %v271_v48 = vld [vmem:[#allocation5 + $0x60] sm:$0xff]  ;;  %v87_v50 = vld [vmem:[#allocation2 + $0x28] sm:$0xff] }
  0x25   :  { %529 = vmatpush.msrb.mxu2 %v347_v27  ;;  %515 = vmatpush.msra.mxu3 %v281_v29  ;;  %v84_v49 = vld [vmem:[#allocation2 + $0x10] sm:$0xff]  ;;  %v90_v51 = vld [vmem:[#allocation2 + $0x40] sm:$0xff]  ;;  %v93_v52 = vld [vmem:[#allocation2 + $0x58] sm:$0xff]  ;;  %v138_v56 = vsel %vm118_vm1, %v87_v50, 0.0 }
  0x26   :  { %454 = vmatpush.msra.mxu0 %v283_v32  ;;  %473 = vmatpush.msra.mxu1 %v334_v34  ;;  %v96_v53 = vld [vmem:[#allocation2 + $0x70] sm:$0xff]  ;;  %v99_v54 = vld [vmem:[#allocation2 + $0x88] sm:$0xff]  ;;  %v119_v55 = vsel %vm118_vm1, %v84_v49, 0.0  ;;  %v157_v57 = vsel %vm118_vm1, %v90_v51, 0.0  ;;  %v102_v58 = vld [vmem:[#allocation2 + $0xa0] sm:$0xff]  ;;  %v139_v61 = vrot.slane %v138_v56, 4 }
  0x27   :  { %530 = vmatpush.msrb.mxu2 %v344_v31  ;;  %516 = vmatpush.msra.mxu3 %v278_v33  ;;  %v105_v59 = vld [vmem:[#allocation2 + $0xb8] sm:$0xff]  ;;  %v120_v60 = vrot.slane %v119_v55, 4  ;;  %v158_v62 = vrot.slane %v157_v57, 4  ;;  %v176_v63 = vsel %vm118_vm1, %v93_v52, 0.0  ;;  %v195_v3 = vsel %vm118_vm1, %v96_v53, 0.0  ;;  %v329_v6 = vld [vmem:[#allocation5 + $0x230] sm:$0xff] }
  0x28   :  { %455 = vmatpush.msra.mxu0 %v280_v36  ;;  %474 = vmatpush.msra.mxu1 %v331_v39  ;;  %v266_v0 = vld [vmem:[#allocation5 + $0x38] sm:$0xff]  ;;  %v177_v2 = vrot.slane %v176_v63, 4  ;;  %v214_v4 = vsel %vm118_vm1, %v99_v54, 0.0  ;;  %v233_v5 = vsel %vm118_vm1, %v102_v58, 0.0  ;;  %v268_v7 = vld [vmem:[#allocation5 + $0x48] sm:$0xff]  ;;  %v140_v9 = vadd.f32 %v139_v61, %v138_v56  ;;  %v263_v12 = vld [vmem:[#allocation5 + $0x20] sm:$0xff] }
  0x29   :  { %531 = vmatpush.msrb.mxu2 %v341_v35  ;;  %517 = vmatpush.msra.mxu3 %v275_v37  ;;  %v322_v1 = vld [vmem:[#allocation5 + $0x1f8] sm:$0xff]  ;;  %v121_v8 = vadd.f32 %v120_v60, %v119_v55  ;;  %v159_v10 = vadd.f32 %v158_v62, %v157_v57  ;;  %v196_v11 = vrot.slane %v195_v3, 4  ;;  %v319_v13 = vld [vmem:[#allocation5 + $0x1e0] sm:$0xff]  ;;  %v215_v15 = vrot.slane %v214_v4, 4  ;;  %v265_v19 = vld [vmem:[#allocation5 + $0x30] sm:$0xff] }
  0x2a   :  { %456 = vmatpush.msra.mxu0 %v277_v42  ;;  %475 = vmatpush.msra.mxu1 %v328_v44  ;;  %v178_v14 = vadd.f32 %v177_v2, %v176_v63  ;;  %v234_v16 = vrot.slane %v233_v5, 4  ;;  %v252_v17 = vsel %vm118_vm1, %v105_v59, 0.0  ;;  %v326_v18 = vld [vmem:[#allocation5 + $0x218] sm:$0xff]  ;;  %v141_v21 = vrot.slane %v140_v9, 2  ;;  %v260_v24 = vld [vmem:[#allocation5 + $0x8] sm:$0xff]  ;;  %v323_v30 = vld [vmem:[#allocation5 + $0x200] sm:$0xff] }
  0x2b   :  { %532 = vmatpush.msrb.mxu2 %v338_v38  ;;  %518 = vmatpush.msra.mxu3 %v272_v40  ;;  %v122_v20 = vrot.slane %v121_v8, 2  ;;  %v160_v22 = vrot.slane %v159_v10, 2  ;;  %v197_v23 = vadd.f32 %v196_v11, %v195_v3  ;;  %v316_v25 = vld [vmem:[#allocation5 + $0x1c8] sm:$0xff]  ;;  %v216_v27 = vadd.f32 %v215_v15, %v214_v4  ;;  %v371_v31 = vld [vmem:[#allocation5 + $0x380] sm:$0xf]  ;;  %v262_v40 = vld [vmem:[#allocation5 + $0x18] sm:$0xff] }
  0x2c   :  { %457 = vmatpush.msra.mxu0 %v274_v45  ;;  %476 = vmatpush.msra.mxu1 %v325_v46  ;;  %v179_v26 = vrot.slane %v178_v14, 2  ;;  %v235_v28 = vadd.f32 %v234_v16, %v233_v5  ;;  %v253_v29 = vrot.slane %v252_v17, 4  ;;  %v142_v33 = vadd.f32 %v141_v21, %v140_v9  ;;  %v320_v42 = vld [vmem:[#allocation5 + $0x1e8] sm:$0xff]  ;;  %v85_v53 = vld [vmem:[#allocation2 + $0x18] sm:$0xff]  ;;  %v259_v54 = vld [vmem:[#allocation5] sm:$0xff] }
  0x2d   :  { %533 = vmatpush.msrb.mxu2 %v335_v41  ;;  %519 = vmatpush.msra.mxu3 %v269_v43  ;;  %v123_v32 = vadd.f32 %v122_v20, %v121_v8  ;;  %v161_v34 = vadd.f32 %v160_v22, %v159_v10  ;;  %v198_v35 = vrot.slane %v197_v23, 2  ;;  %v217_v37 = vrot.slane %v216_v27, 2  ;;  %v313_v41 = vld [vmem:[#allocation5 + $0x1b0] sm:$0xff]  ;;  %v368_v43 = vld [vmem:[#allocation5 + $0x368] sm:$0xff]  ;;  %v310_v55 = vld [vmem:[#allocation5 + $0x198] sm:$0xff] }
  0x2e   :  { %458 = vmatpush.msra.mxu0 %v271_v48  ;;  %477 = vmatpush.msra.mxu1 %v322_v1  ;;  %v180_v36 = vadd.f32 %v179_v26, %v178_v14  ;;  %v236_v38 = vrot.slane %v235_v28, 2  ;;  %v254_v39 = vadd.f32 %v253_v29, %v252_v17  ;;  %v143_v45 = vrot.slane %v142_v33, 1  ;;  %v82_v48 = vld [vmem:[#allocation2] sm:$0xff]  ;;  %v317_v60 = vld [vmem:[#allocation5 + $0x1d0] sm:$0xff]  ;;  %v91_v3 = vld [vmem:[#allocation2 + $0x48] sm:$0xff] }
  0x2f   :  { %534 = vmatpush.msrb.mxu2 %v332_v47  ;;  %520 = vmatpush.msra.mxu3 %v266_v0  ;;  %v124_v44 = vrot.slane %v123_v32, 1  ;;  %v162_v46 = vrot.slane %v161_v34, 1  ;;  %v199_v47 = vadd.f32 %v198_v35, %v197_v23  ;;  %v218_v50 = vadd.f32 %v217_v37, %v216_v27  ;;  %v365_v61 = vld [vmem:[#allocation5 + $0x350] sm:$0xff]  ;;  %v307_v4 = vld [vmem:[#allocation5 + $0x180] sm:$0xff]  ;;  %v314_v10 = vld [vmem:[#allocation5 + $0x1b8] sm:$0xff] }
  0x30   :  { %459 = vmatpush.msra.mxu0 %v268_v7  ;;  %478 = vmatpush.msra.mxu1 %v319_v13  ;;  %v181_v49 = vrot.slane %v180_v36, 1  ;;  %v237_v51 = vadd.f32 %v236_v38, %v235_v28  ;;  %v255_v52 = vrot.slane %v254_v39, 2  ;;  %v144_v57 = vadd.f32 %v143_v45, %v142_v33  ;;  %v88_v2 = vld [vmem:[#allocation2 + $0x30] sm:$0xff]  ;;  %v94_v7 = vld [vmem:[#allocation2 + $0x60] sm:$0xff]  ;;  %v362_v11 = vld [vmem:[#allocation5 + $0x338] sm:$0xff] }
  0x31   :  { %535 = vmatpush.msrb.mxu2 %v329_v6  ;;  %521 = vmatpush.msra.mxu3 %v263_v12  ;;  %v125_v56 = vadd.f32 %v124_v44, %v123_v32  ;;  %v163_v58 = vadd.f32 %v162_v46, %v161_v34  ;;  %v200_v59 = vrot.slane %v199_v47, 1  ;;  %v219_v63 = vrot.slane %v218_v50, 1  ;;  %v97_v17 = vld [vmem:[#allocation2 + $0x78] sm:$0xff]  ;;  %v311_v21 = vld [vmem:[#allocation5 + $0x1a0] sm:$0xff]  ;;  %v100_v28 = vld [vmem:[#allocation2 + $0x90] sm:$0xff] }
  0x32   :  { %460 = vmatpush.msra.mxu0 %v265_v19  ;;  %479 = vmatpush.msra.mxu1 %v316_v25  ;;  %v182_v62 = vadd.f32 %v181_v49, %v180_v36  ;;  %v238_v0 = vrot.slane %v237_v51, 1  ;;  %v256_v1 = vadd.f32 %v255_v52, %v254_v39  ;;  %v106_v8 = vrot.slane %v82_v48, 4  ;;  %v359_v22 = vld [vmem:[#allocation5 + $0x320] sm:$0xff]  ;;  %v356_v32 = vld [vmem:[#allocation5 + $0x308] sm:$0xff]  ;;  %v306_v33 = vld [vmem:[#allocation5 + $0x178] sm:$0xff] }
  0x33   :  { %536 = vmatpush.msrb.mxu2 %v326_v18  ;;  %522 = vmatpush.msra.mxu3 %v260_v24  ;;  %v201_v5 = vadd.f32 %v200_v59, %v199_v47  ;;  %v426_v6 = vsel %vm405_vm2, %v144_v57, %v125_v56  ;;  %v126_v9 = vrot.slane %v85_v53, 4  ;;  %v220_v12 = vadd.f32 %v219_v63, %v218_v50  ;;  %v103_v35 = vld [vmem:[#allocation2 + $0xa8] sm:$0xff]  ;;  %v297_v59 = vld [vmem:[#allocation5 + $0x130] sm:$0xff] }
  0x34   :  { %461 = vmatpush.msra.mxu0 %v262_v40  ;;  %480 = vmatpush.msra.mxu1 %v313_v41  ;;  %v239_v13 = vadd.f32 %v238_v0, %v237_v51  ;;  %v257_v14 = vrot.slane %v256_v1, 1  ;;  %v427_v15 = vsel %vm407_vm3, %v163_v58, %v426_v6  ;;  %v107_v18 = vadd.f32 %v106_v8, %v82_v48  ;;  %v308_v39 = vld [vmem:[#allocation5 + $0x188] sm:$0xff]  ;;  %v303_v40 = vld [vmem:[#allocation5 + $0x160] sm:$0xff] }
  0x35   :  { %537 = vmatpush.msrb.mxu2 %v323_v30  ;;  %778 = vmatpush.msk.msrb.mxu3 %vm437_vm0, %v371_v31  ;;  %v428_v16 = vsel %vm409_vm4, %v182_v62, %v427_v15  ;;  %v127_v19 = vadd.f32 %v126_v9, %v85_v53  ;;  %v145_v20 = vrot.slane %v88_v2, 4  ;;  %v164_v25 = vrot.slane %v91_v3, 4  ;;  %v300_v49 = vld [vmem:[#allocation5 + $0x148] sm:$0xff]  ;;  %v89_v9 = vld [vmem:[#allocation2 + $0x38] sm:$0xff]  ;;  %v291_v15 = vld [vmem:[#allocation5 + $0x100] sm:$0xff] }
  0x36   :  { %462 = vmatpush.msra.mxu0 %v259_v54  ;;  %481 = vmatpush.msra.mxu1 %v310_v55  ;;  %v258_v23 = vadd.f32 %v257_v14, %v256_v1  ;;  %v429_v24 = vsel %vm411_vm5, %v201_v5, %v428_v16  ;;  %v183_v26 = vrot.slane %v94_v7, 4  ;;  %v108_v29 = vrot.slane %v107_v18, 2  ;;  %v83_v58 = vld [vmem:[#allocation2 + $0x8] sm:$0xff]  ;;  %v294_v5 = vld [vmem:[#allocation5 + $0x118] sm:$0xff] }
  0x37   :  { %538 = vmatpush.msrb.mxu2 %v320_v42  ;;  %558 = vmatpush.msrb.mxu3 %v368_v43  ;;  %v430_v27 = vsel %vm413_vm6, %v220_v12, %v429_v24  ;;  %v128_v30 = vrot.slane %v127_v19, 2  ;;  %v146_v31 = vadd.f32 %v145_v20, %v88_v2  ;;  %v165_v36 = vadd.f32 %v164_v25, %v91_v3  ;;  %v95_v24 = vld [vmem:[#allocation2 + $0x68] sm:$0xff] }
  0x38   :  { %482 = vmatpush.msra.mxu1 %v307_v4  ;;  %v431_v34 = vsel %vm415_vm7, %v239_v13, %v430_v27  ;;  %v184_v37 = vadd.f32 %v183_v26, %v94_v7  ;;  %v202_v38 = vrot.slane %v97_v17, 4  ;;  %v109_v42 = vadd.f32 %v108_v29, %v107_v18  ;;  %v86_v4 = vld [vmem:[#allocation2 + $0x20] sm:$0xff]  ;;  %v92_v18 = vld [vmem:[#allocation2 + $0x50] sm:$0xff]  ;;  %v288_v26 = vld [vmem:[#allocation5 + $0xe8] sm:$0xff] }
  0x39   :  { %539 = vmatpush.msrb.mxu2 %v317_v60  ;;  %559 = vmatpush.msrb.mxu3 %v365_v61  ;;  %v1000_v41 = vsel %vm417_vm8, %v258_v23, %v431_v34  ;;  %v129_v43 = vadd.f32 %v128_v30, %v127_v19  ;;  %v147_v44 = vrot.slane %v146_v31, 2  ;;  %v166_v45 = vrot.slane %v165_v36, 2  ;;  %v98_v29 = vld [vmem:[#allocation2 + $0x80] sm:$0xff] }
  0x3a   :  { %567 = vmatpush.msrb.mxu1 %v306_v33  ;;  %777 = vmatmul.msk.f32.vlgmr.msra.gmra.mxu2 %vm118_vm1, %v1000_v41  ;;  %v185_v46 = vrot.slane %v184_v37, 2  ;;  %v203_v47 = vadd.f32 %v202_v38, %v97_v17  ;;  %v221_v48 = vrot.slane %v100_v28, 4  ;;  %v110_v50 = vrot.slane %v109_v42, 1  ;;  %v101_v38 = vld [vmem:[#allocation2 + $0x98] sm:$0xff] }
  0x3b   :  { %540 = vmatpush.msrb.mxu2 %v314_v10  ;;  %560 = vmatpush.msrb.mxu3 %v362_v11  ;;  %v130_v51 = vrot.slane %v129_v43, 1  ;;  %v148_v52 = vadd.f32 %v147_v44, %v146_v31  ;;  %v240_v53 = vrot.slane %v103_v35, 4  ;;  %v167_v54 = vadd.f32 %v166_v45, %v165_v36  ;;  %v285_v36 = vld [vmem:[#allocation5 + $0xd0] sm:$0xff] }
  0x3c   :  { %568 = vmatpush.msrb.mxu1 %v303_v40  ;;  %v186_v55 = vadd.f32 %v185_v46, %v184_v37  ;;  %v204_v56 = vrot.slane %v203_v47, 2  ;;  %v222_v57 = vadd.f32 %v221_v48, %v100_v28  ;;  %v111_v60 = vadd.f32 %v110_v50, %v109_v42  ;;  %v104_v45 = vld [vmem:[#allocation2 + $0xb0] sm:$0xff]  ;;  %v282_v50 = vld [vmem:[#allocation5 + $0xb8] sm:$0xff] }
  0x3d   :  { %541 = vmatpush.msrb.mxu2 %v311_v21  ;;  %561 = vmatpush.msrb.mxu3 %v359_v22  ;;  %v131_v61 = vadd.f32 %v130_v51, %v129_v43  ;;  %v149_v62 = vrot.slane %v148_v52, 1  ;;  %v241_v63 = vadd.f32 %v240_v53, %v103_v35  ;;  %v168_v0 = vrot.slane %v167_v54, 1  ;;  %v372_v43 = vld [vmem:[#allocation5 + $0x388] sm:$0xf] }
  0x3e   :  { %569 = vmatpush.msrb.mxu1 %v300_v49  ;;  %v187_v1 = vrot.slane %v186_v55, 1  ;;  %v205_v2 = vadd.f32 %v204_v56, %v203_v47  ;;  %v223_v3 = vrot.slane %v222_v57, 2  ;;  %v112_v10 = vrot.slane %v83_v58, 4  ;;  %v354_v49 = vld [vmem:[#allocation5 + $0x2f8] sm:$0xff]  ;;  %780 = vmatpush.msk.msrb.mxu0 %vm437_vm0, %v372_v43 }
  0x3f   :  { %562 = vmatpush.msrb.mxu3 %v356_v32  ;;  %542 = vmatpush.msrb.mxu2 %v308_v39  ;;  %v150_v6 = vadd.f32 %v149_v62, %v148_v52  ;;  %v242_v7 = vrot.slane %v241_v63, 2  ;;  %v406_v8 = vsel %vm405_vm2, %v131_v61, %v111_v60  ;;  %v169_v11 = vadd.f32 %v168_v0, %v167_v54  ;;  %v351_v60 = vld [vmem:[#allocation5 + $0x2e0] sm:$0xff]  ;;  %v651_v43 = vld [vmem:[#allocation8 + $0x60] sm:$0xff] }
  0x40   :  { %570 = vmatpush.msrb.mxu1 %v297_v59  ;;  %v188_v12 = vadd.f32 %v187_v1, %v186_v55  ;;  %v206_v13 = vrot.slane %v205_v2, 1  ;;  %v224_v14 = vadd.f32 %v223_v3, %v222_v57  ;;  %v113_v19 = vadd.f32 %v112_v10, %v83_v58  ;;  %v369_v55 = vld [vmem:[#allocation5 + $0x370] sm:$0xff]  ;;  %v279_v61 = vld [vmem:[#allocation5 + $0xa0] sm:$0xff] }
  0x41   :  { %v243_v16 = vadd.f32 %v242_v7, %v241_v63  ;;  %v408_v17 = vsel %vm407_vm3, %v150_v6, %v406_v8  ;;  %v132_v20 = vrot.slane %v86_v4, 4  ;;  %v151_v25 = vrot.slane %v89_v9, 4  ;;  %v348_v7 = vld [vmem:[#allocation5 + $0x2c8] sm:$0xff]  ;;  %618 = vmatpush.msrb.mxu0 %v369_v55 }
  0x42   :  { %571 = vmatpush.msrb.mxu1 %v294_v5  ;;  %v207_v21 = vadd.f32 %v206_v13, %v205_v2  ;;  %v225_v22 = vrot.slane %v224_v14, 1  ;;  %v410_v23 = vsel %vm409_vm4, %v169_v11, %v408_v17  ;;  %v114_v30 = vrot.slane %v113_v19, 2  ;;  %v366_v2 = vld [vmem:[#allocation5 + $0x358] sm:$0xff]  ;;  %v276_v8 = vld [vmem:[#allocation5 + $0x88] sm:$0xff]  ;;  %v363_v13 = vld [vmem:[#allocation5 + $0x340] sm:$0xff] }
  0x43   :  { %v244_v27 = vrot.slane %v243_v16, 1  ;;  %v412_v28 = vsel %vm411_vm5, %v188_v12, %v410_v23  ;;  %v133_v31 = vadd.f32 %v132_v20, %v86_v4  ;;  %v152_v34 = vadd.f32 %v151_v25, %v89_v9  ;;  %v654_v9 = vld [vmem:[#allocation8 + $0x78] sm:$0xff]  ;;  %619 = vmatpush.msrb.mxu0 %v366_v2 }
  0x44   :  { %572 = vmatpush.msrb.mxu1 %v291_v15  ;;  %v226_v32 = vadd.f32 %v225_v22, %v224_v14  ;;  %v414_v33 = vsel %vm413_vm6, %v207_v21, %v412_v28  ;;  %v170_v35 = vrot.slane %v92_v18, 4  ;;  %v115_v39 = vadd.f32 %v114_v30, %v113_v19  ;;  %v653_v14 = vld [vmem:[#allocation8 + $0x70] sm:$0xff]  ;;  %v345_v19 = vld [vmem:[#allocation5 + $0x2b0] sm:$0xff]  ;;  %687 = vmatpush.msra.mxu2 %v654_v9  ;;  %v270_v30 = vld [vmem:[#allocation5 + $0x58] sm:$0xff] }
  0x45   :  { %v245_v37 = vadd.f32 %v244_v27, %v243_v16  ;;  %v134_v40 = vrot.slane %v133_v31, 2  ;;  %v189_v42 = vrot.slane %v95_v24, 4  ;;  %v153_v46 = vrot.slane %v152_v34, 2  ;;  %v273_v20 = vld [vmem:[#allocation5 + $0x70] sm:$0xff]  ;;  %620 = vmatpush.msrb.mxu0 %v363_v13  ;;  %v664_v9 = vld [vmem:[#allocation8 + $0xc8] sm:$0xff] }
  0x46   :  { %573 = vmatpush.msrb.mxu1 %v288_v26  ;;  %v416_v44 = vsel %vm415_vm7, %v226_v32, %v414_v33  ;;  %v171_v47 = vadd.f32 %v170_v35, %v92_v18  ;;  %v208_v48 = vrot.slane %v98_v29, 4  ;;  %v116_v52 = vrot.slane %v115_v39, 1  ;;  %688 = vmatpush.msra.mxu2 %v653_v14  ;;  %v357_v33 = vld [vmem:[#allocation5 + $0x310] sm:$0xff]  ;;  %v641_v14 = vld [vmem:[#allocation8 + $0x10] sm:$0xff] }
  0x47   :  { %v1012_v51 = vsel %vm417_vm8, %v245_v37, %v416_v44  ;;  %v135_v53 = vadd.f32 %v134_v40, %v133_v31  ;;  %v190_v54 = vadd.f32 %v189_v42, %v95_v24  ;;  %v154_v56 = vadd.f32 %v153_v46, %v152_v34  ;;  %v360_v24 = vld [vmem:[#allocation5 + $0x328] sm:$0xff]  ;;  %v652_v34 = vld [vmem:[#allocation8 + $0x68] sm:$0xff]  ;;  %v309_v2 = vld [vmem:[#allocation5 + $0x190] sm:$0xff] }
  0x48   :  { %574 = vmatpush.msrb.mxu1 %v285_v36  ;;  %523 = vmatmul.f32.vlgmr.msra.gmra.mxu3 %v1012_v51  ;;  %v172_v57 = vrot.slane %v171_v47, 2  ;;  %v209_v58 = vadd.f32 %v208_v48, %v98_v29  ;;  %v227_v59 = vrot.slane %v101_v38, 4  ;;  %v117_v62 = vadd.f32 %v116_v52, %v115_v39  ;;  %v342_v29 = vld [vmem:[#allocation5 + $0x298] sm:$0xff]  ;;  %v267_v39 = vld [vmem:[#allocation5 + $0x40] sm:$0xff]  ;;  %v336_v46 = vld [vmem:[#allocation5 + $0x268] sm:$0xff] }
  0x49   :  { %463 = vmatmul.f32.vlgmr.msra.gmra.mxu0 %v1012_v51  ;;  %v136_v63 = vrot.slane %v135_v53, 1  ;;  %v191_v0 = vrot.slane %v190_v54, 2  ;;  %v246_v1 = vrot.slane %v104_v45, 4  ;;  %587 = vmatpush.msra.mxu3 %v354_v49  ;;  %v155_v3 = vrot.slane %v154_v56, 1  ;;  %v261_v52 = vld [vmem:[#allocation5 + $0x10] sm:$0xff] }
  0x4a   :  { %575 = vmatpush.msrb.mxu1 %v282_v50  ;;  %v173_v4 = vadd.f32 %v172_v57, %v171_v47  ;;  %v210_v5 = vrot.slane %v209_v58, 2  ;;  %v228_v6 = vadd.f32 %v227_v59, %v101_v38  ;;  %v339_v38 = vld [vmem:[#allocation5 + $0x280] sm:$0xff]  ;;  %621 = vmatpush.msrb.mxu0 %v360_v24  ;;  %v264_v47 = vld [vmem:[#allocation5 + $0x28] sm:$0xff]  ;;  %v333_v50 = vld [vmem:[#allocation5 + $0x250] sm:$0xff] }
  0x4b   :  { %v137_v10 = vadd.f32 %v136_v63, %v135_v53  ;;  %v192_v11 = vadd.f32 %v191_v0, %v190_v54  ;;  %v247_v12 = vadd.f32 %v246_v1, %v104_v45  ;;  %588 = vmatpush.msra.mxu3 %v351_v60  ;;  %v156_v15 = vadd.f32 %v155_v3, %v154_v56  ;;  %v650_v54 = vld [vmem:[#allocation8 + $0x58] sm:$0xff]  ;;  %v330_v56 = vld [vmem:[#allocation5 + $0x238] sm:$0xff]  ;;  %v649_v57 = vld [vmem:[#allocation8 + $0x50] sm:$0xff] }
  0x4c   :  { %576 = vmatpush.msrb.mxu1 %v279_v61  ;;  %v174_v16 = vrot.slane %v173_v4, 1  ;;  %v211_v17 = vadd.f32 %v210_v5, %v209_v58  ;;  %v229_v18 = vrot.slane %v228_v6, 2  ;;  %622 = vmatpush.msrb.mxu0 %v357_v33  ;;  %v670_v55 = vld [vmem:[#allocation8 + $0xf8] sm:$0xff]  ;;  %v669_v58 = vld [vmem:[#allocation8 + $0xf0] sm:$0xff]  ;;  %v648_v60 = vld [vmem:[#allocation8 + $0x48] sm:$0xff] }
  0x4d   :  { %v193_v21 = vrot.slane %v192_v11, 1  ;;  %v248_v22 = vrot.slane %v247_v12, 2  ;;  %v419_v23 = vsel %vm405_vm2, %v137_v10, %v117_v62  ;;  %589 = vmatpush.msra.mxu3 %v348_v7  ;;  %689 = vmatpush.msra.mxu2 %v652_v34  ;;  %v327_v59 = vld [vmem:[#allocation5 + $0x220] sm:$0xff]  ;;  %v324_v61 = vld [vmem:[#allocation5 + $0x208] sm:$0xff]  ;;  %v321_v62 = vld [vmem:[#allocation5 + $0x1f0] sm:$0xff] }
  0x4e   :  { %577 = vmatpush.msrb.mxu1 %v276_v8  ;;  %v175_v25 = vadd.f32 %v174_v16, %v173_v4  ;;  %v212_v26 = vrot.slane %v211_v17, 1  ;;  %v230_v27 = vadd.f32 %v229_v18, %v228_v6  ;;  %v420_v28 = vsel %vm407_vm3, %v156_v15, %v419_v23  ;;  %707 = vmatpush.msra.mxu0 %v670_v55  ;;  %v318_v63 = vld [vmem:[#allocation5 + $0x1d8] sm:$0xff]  ;;  %v315_v0 = vld [vmem:[#allocation5 + $0x1c0] sm:$0xff]  ;;  %v312_v1 = vld [vmem:[#allocation5 + $0x1a8] sm:$0xff] }
  0x4f   :  { %v194_v31 = vadd.f32 %v193_v21, %v192_v11  ;;  %v249_v32 = vadd.f32 %v248_v22, %v247_v12  ;;  %590 = vmatpush.msra.mxu3 %v345_v19  ;;  %690 = vmatpush.msra.mxu2 %v651_v43  ;;  %v647_v3 = vld [vmem:[#allocation8 + $0x40] sm:$0xff]  ;;  %v646_v5 = vld [vmem:[#allocation8 + $0x38] sm:$0xff]  ;;  %v645_v7 = vld [vmem:[#allocation8 + $0x30] sm:$0xff] }
  0x50   :  { %578 = vmatpush.msrb.mxu1 %v273_v20  ;;  %v213_v35 = vadd.f32 %v212_v26, %v211_v17  ;;  %v231_v36 = vrot.slane %v230_v27, 1  ;;  %v421_v37 = vsel %vm409_vm4, %v175_v25, %v420_v28  ;;  %779 = vmatmul.msk.f32.vlgmr.msrb.gmra.mxu3 %vm118_vm1, %v1000_v41  ;;  %v667_v4 = vld [vmem:[#allocation8 + $0xe0] sm:$0xff]  ;;  %v666_v6 = vld [vmem:[#allocation8 + $0xd8] sm:$0xff]  ;;  %v665_v8 = vld [vmem:[#allocation8 + $0xd0] sm:$0xff] }
  0x51   :  { %v250_v40 = vrot.slane %v249_v32, 1  ;;  %v422_v42 = vsel %vm411_vm5, %v194_v31, %v421_v37  ;;  %591 = vmatpush.msra.mxu3 %v342_v29  ;;  %781 = vmatmul.msk.f32.vlgmr.msrb.gmra.mxu0 %vm118_vm1, %v1000_v41  ;;  %v668_v41 = vld [vmem:[#allocation8 + $0xe8] sm:$0xff]  ;;  %v643_v10 = vld [vmem:[#allocation8 + $0x20] sm:$0xff]  ;;  %v642_v12 = vld [vmem:[#allocation8 + $0x18] sm:$0xff] }
  0x52   :  { %579 = vmatpush.msrb.mxu1 %v270_v30  ;;  %v232_v44 = vadd.f32 %v231_v36, %v230_v27  ;;  %v423_v45 = vsel %vm413_vm6, %v213_v35, %v422_v42  ;;  %691 = vmatpush.msra.mxu2 %v650_v54  ;;  %v663_v11 = vld [vmem:[#allocation8 + $0xc0] sm:$0xff]  ;;  %v662_v13 = vld [vmem:[#allocation8 + $0xb8] sm:$0xff]  ;;  %v661_v15 = vld [vmem:[#allocation8 + $0xb0] sm:$0xff] }
  0x53   :  { %v251_v48 = vadd.f32 %v250_v40, %v249_v32  ;;  %592 = vmatpush.msra.mxu3 %v339_v38  ;;  %708 = vmatpush.msra.mxu0 %v669_v58  ;;  %v640_v16 = vld [vmem:[#allocation8 + $0x8] sm:$0xff]  ;;  %v639_v18 = vld [vmem:[#allocation8] sm:$0xff]  ;;  %v658_v20 = vld [vmem:[#allocation8 + $0x98] sm:$0xff] }
  0x54   :  { %580 = vmatpush.msrb.mxu1 %v267_v39  ;;  %v424_v49 = vsel %vm415_vm7, %v232_v44, %v423_v45  ;;  %692 = vmatpush.msra.mxu2 %v649_v57  ;;  %v660_v17 = vld [vmem:[#allocation8 + $0xa8] sm:$0xff]  ;;  %v659_v19 = vld [vmem:[#allocation8 + $0xa0] sm:$0xff]  ;;  %v657_v21 = vld [vmem:[#allocation8 + $0x90] sm:$0xff] }
  0x55   :  { %v425_v53 = vsel %vm417_vm8, %v251_v48, %v424_v49  ;;  %593 = vmatpush.msra.mxu3 %v336_v46  ;;  %709 = vmatpush.msra.mxu0 %v668_v41  ;;  %v656_v22 = vld [vmem:[#allocation8 + $0x88] sm:$0xff]  ;;  %v655_v23 = vld [vmem:[#allocation8 + $0x80] sm:$0xff]  ;;  %v373_v24 = vld [vmem:[#allocation7] sm:$0x7] }
  0x56   :  { %581 = vmatpush.msrb.mxu1 %v264_v47  ;;  %543 = vmatmul.f32.vlgmr.msrb.gmra.mxu2 %v425_v53  ;;  %v375_v25 = vperm.slane %v373_v24, 0  ;;  %v676_v30 = vld [vmem:[#allocation8 + $0x128] sm:$0xf]  ;;  %v675_v31 = vld [vmem:[#allocation8 + $0x120] sm:$0xff]  ;;  %v376_v32 = vperm.slane %v373_v24, 1  ;;  %v674_v33 = vld [vmem:[#allocation8 + $0x118] sm:$0xff] }
  0x57   :  { %483 = vmatmul.f32.vlgmr.msra.gmra.mxu1 %v425_v53  ;;  %594 = vmatpush.msra.mxu3 %v333_v50  ;;  %v673_v36 = vld [vmem:[#allocation8 + $0x110] sm:$0xff]  ;;  %v672_v39 = vld [vmem:[#allocation8 + $0x108] sm:$0xff]  ;;  %v671_v40 = vld [vmem:[#allocation8 + $0x100] sm:$0xff]  ;;  %v377_v50 = vperm.slane %v373_v24, 2 }
  0x58   :  { %582 = vmatpush.msrb.mxu1 %v261_v52  ;;  %693 = vmatpush.msra.mxu2 %v648_v60 }
  0x59   :  { %595 = vmatpush.msra.mxu3 %v330_v56  ;;  %710 = vmatpush.msra.mxu0 %v667_v4 }
  0x5a   :  { %694 = vmatpush.msra.mxu2 %v647_v3  ;;  %782 = vmatpush.msk.msra.mxu1 %vm437_vm0, %v676_v30 }
  0x5b   :  { %596 = vmatpush.msra.mxu3 %v327_v59  ;;  %711 = vmatpush.msra.mxu0 %v666_v6 }
  0x5c   :  { %695 = vmatpush.msra.mxu2 %v646_v5  ;;  %738 = vmatpush.msra.mxu1 %v675_v31 }
  0x5d   :  { %597 = vmatpush.msra.mxu3 %v324_v61  ;;  %712 = vmatpush.msra.mxu0 %v665_v8 }
  0x5e   :  { %696 = vmatpush.msra.mxu2 %v645_v7  ;;  %739 = vmatpush.msra.mxu1 %v674_v33 }
  0x5f   :  { %583 = vmatmul.f32.vlgmr.msrb.gmra.mxu1 %v1012_v51  ;;  %598 = vmatpush.msra.mxu3 %v321_v62  ;;  %v644_v51 = vld [vmem:[#allocation8 + $0x28] sm:$0xff] }
  0x60   :  { %697 = vmatpush.msra.mxu2 %v644_v51  ;;  %713 = vmatpush.msra.mxu0 %v664_v9  ;;  %v793_v62 = vld [vmem:[%s1040_s4] ss:$0 sm:$0xff]  ;;  %s764_s4 = sshll.u32 %s1041_s5, 4  ;;  %s765_s4 = int_to_ptr.hbm [resolvable:$true] %s764_s4 }
  0x61   :  { %599 = vmatpush.msra.mxu3 %v318_v63  ;;  %740 = vmatpush.msra.mxu1 %v673_v36 }
  0x62   :  { %698 = vmatpush.msra.mxu2 %v643_v10  ;;  %714 = vmatpush.msra.mxu0 %v663_v11 }
  0x63   :  { %600 = vmatpush.msra.mxu3 %v315_v0  ;;  %741 = vmatpush.msra.mxu1 %v672_v39 }
  0x64   :  { %699 = vmatpush.msra.mxu2 %v642_v12  ;;  %715 = vmatpush.msra.mxu0 %v662_v13 }
  0x65   :  { %601 = vmatpush.msra.mxu3 %v312_v1  ;;  %742 = vmatpush.msra.mxu1 %v671_v40 }
  0x66   :  { %700 = vmatpush.msra.mxu2 %v641_v14  ;;  %716 = vmatpush.msra.mxu0 %v661_v15 }
  0x67   :  { %602 = vmatpush.msra.mxu3 %v309_v2 }
  0x68   :  { %603 = vmatmul.f32.vlgmr.msra.gmra.mxu3 %v425_v53  ;;  %701 = vmatpush.msra.mxu2 %v640_v16 }
  0x69   :  { %717 = vmatpush.msra.mxu0 %v660_v17 }
  0x6a   :  { %702 = vmatpush.msra.mxu2 %v639_v18 }
  0x6b   :  { %718 = vmatpush.msra.mxu0 %v659_v19 }
  0x6d   :  { %719 = vmatpush.msra.mxu0 %v658_v20 }
  0x6f   :  { %720 = vmatpush.msra.mxu0 %v657_v21 }
  0x71   :  { %721 = vmatpush.msra.mxu0 %v656_v22 }
  0x73   :  { %722 = vmatpush.msra.mxu0 %v655_v23 }
  0xbd   :  { %v504_v27 = vpop.f32.mrf.mxu2 }
  0xc6   :  { %v464_v26 = vpop.f32.mrf.mxu0 }
  0xc7   :  { %v465_v29 = vadd.f32 %v464_v26, %v375_v25 }
  0xcb   :  { %v524_v28 = vpop.f32.mrf.mxu3 }
  0xcc   :  { %v525_v38 = vadd.f32 %v524_v28, %v376_v32 }
  0xce   :  { %v624_v57 = vpop.f32.mrf.mxu0 }
  0xd3   :  { %v564_v43 = vpop.f32.mrf.mxu3 }
  0xd4   :  { %v484_v34 = vpop.f32.mrf.mxu1 }
  0xd5   :  { %v485_v35 = vadd.f32 %v484_v34, %v465_v29 }
  0xd7   :  { %v505_v37 = vadd.f32 %v504_v27, %v485_v35 }
  0xd9   :  { %794 = vtanh.f32 %v505_v37  ;;  %v544_v42 = vpop.f32.mrf.mxu2 }
  0xda   :  { %v545_v44 = vadd.f32 %v544_v42, %v525_v38 }
  0xdc   :  { %v565_v45 = vadd.f32 %v564_v43, %v545_v44  ;;  %v584_v53 = vpop.f32.mrf.mxu1 }
  0xdd   :  { %v585_v55 = vadd.f32 %v584_v53, %v377_v50 }
  0xde   :  { %796 = vtanh.f32 %v565_v45 }
  0xdf   :  { %v795_v46 = vpop.eup %794 }
  0xe0   :  { %vm630_vm9 = vcmp.gt.f32.partialorder %v795_v46, 0.0  ;;  %v633_v47 = vmul.f32 0.25, %v795_v46 }
  0xe2   :  { %v636_v48 = vsel %vm630_vm9, %v795_v46, %v633_v47 }
  0xe3   :  { %703 = vmatmul.f32.vlgmr.msra.gmra.mxu2 %v636_v48 }
  0xe4   :  { %v797_v49 = vpop.eup %796 }
  0xe5   :  { %vm631_vm10 = vcmp.gt.f32.partialorder %v797_v49, 0.0  ;;  %v634_v52 = vmul.f32 0.25, %v797_v49 }
  0xe7   :  { %v637_v54 = vsel %vm631_vm10, %v797_v49, %v634_v52 }
  0xe8   :  { %723 = vmatmul.f32.vlgmr.msra.gmra.mxu0 %v637_v54 }
  0xeb   :  { %v604_v56 = vpop.f32.mrf.mxu3 }
  0xec   :  { %v605_v58 = vadd.f32 %v604_v56, %v585_v55 }
  0xee   :  { %v625_v59 = vadd.f32 %v624_v57, %v605_v58 }
  0xf0   :  { %798 = vtanh.f32 %v625_v59 }
  0xf6   :  { %v799_v60 = vpop.eup %798 }
  0xf7   :  { %vm632_vm11 = vcmp.gt.f32.partialorder %v799_v60, 0.0  ;;  %v635_v41 = vmul.f32 0.25, %v799_v60 }
  0xf9   :  { %v638_v61 = vsel %vm632_vm11, %v799_v60, %v635_v41 }
  0xfa   :  { %783 = vmatmul.msk.f32.vlgmr.msra.gmra.mxu1 %vm118_vm1, %v638_v61 }
 0x165   :  { %v724_v1 = vpop.f32.mrf.mxu0 }
 0x166   :  { %v704_v63 = vpop.f32.mrf.mxu2 }
 0x167   :  { %v705_v0 = vadd.f32 %v793_v62, %v704_v63 }
 0x169   :  { %v725_v2 = vadd.f32 %v724_v1, %v705_v0 }
 0x177   :  { %v744_v3 = vpop.f32.mrf.mxu1 }
 0x178   :  { %v745_v4 = vadd.f32 %v744_v3, %v725_v2 }
 0x17a   :  { %747 = vmax.xlane.f32.xlu0 %v745_v4 }
 0x1ed   :  { %v748_v5 = vpop.xlane.xlu0 %747 }
 0x1ee   :  { %v749_v6 = vsub.f32 %v745_v4, %v748_v5 }
 0x1f0   :  { %v750_v7 = vmul.f32 1.442695, %v749_v6 }
 0x1f2   :  { %800 = vpow2.f32 %v750_v7 }
 0x1f8   :  { %v801_v8 = vpop.eup %800 }
 0x1f9   :  { %752 = vadd.xlane.f32.xlu0 %v801_v8 }
 0x26c   :  { %v753_v51 = vpop.xlane.xlu0 %752 }
 0x26d   :  { %802 = vrcp.f32 %v753_v51 }
 0x273   :  { %v803_v9 = vpop.eup %802 }
 0x274   :  { %v755_v10 = vmul.f32 %v803_v9, %v801_v8 }
 0x276   :  { %756 = vst [vmem:[#allocation10] sm:$0xff] %v755_v10 }
 0x277   :  { %767 = dma.vmem_to_hbm [thread:$0]  %s763_s16, 128, %s765_s4, [#allocation4]  }
 0x278   :  { %930 = dma.done.wait [#allocation4], 128  }
 0x279   :  { %931 = vsyncadd [#allocation4], 4294967168 }
 0x27a   :  { %772 = vsyncpa [#allocation3], 1 }
 0x27b   :  { %773 = vsyncpa [#allocation6], 1 }
 0x27c   :  { %774 = vsyncpa [#allocation9], 1 }
 0x27d   :  { %775 = vsyncpa [#allocation4], 1 }

</bundles_post_ra>
